<compile_context>
chip_gen: v7x
topology: tpu7x:2x2x1
jax: 0.10.0
libtpu: 0.0.40
codegen_flags: <defaults>
</compile_context>

<pallas_src>
import functools

import jax
import jax.numpy as jnp
from jax.experimental import pallas as pl
from jax.experimental.pallas import tpu as pltpu


def _round_up(x, m):
    return ((x + m - 1) // m) * m


def rgcn_kernel(xj_ref, et_ref, dst_ref, coef_ref, wcat_ref, x_ref, root_ref,
                bias_ref, o_ref, acc_ref, *, num_relations, out_dim, tile_n):
    """One (N-tile, E-tile) grid step.

    acc[i-tile] = x_tile @ root + bias            (at first E step)
                 + sum_e S_block @ (coef * msg)   (every E step)
    out[i-tile] = acc[i-tile]                     (at last E step)
    """
    e_idx = pl.program_id(1)

    # ---- init: root transform + bias land directly in the accumulator ----
    @pl.when(e_idx == 0)
    def _init():
        root_term = jnp.dot(x_ref[...], root_ref[...],
                            preferred_element_type=jnp.float32)    # [tile_N, D]
        acc_ref[...] = root_term + bias_ref[...]

    # ---- message path: one lane-dense MXU matmul -> [tile_E, R*D] ----
    msg_all = jnp.dot(xj_ref[...], wcat_ref[...],
                      preferred_element_type=jnp.float32)           # [tile_E, R*D]

    et = et_ref[...]                                                # [tile_E, 1] int32
    tile_e = et.shape[0]
    msg = jnp.zeros((tile_e, out_dim), jnp.float32)
    # Per-relation select == gather of W[edge_type]; R is small, fully unrolled.
    for r in range(num_relations):
        mask_r = (et == r).astype(jnp.float32)                      # [tile_E, 1]
        msg = msg + mask_r * msg_all[:, r * out_dim:(r + 1) * out_dim]

    # Fold edge_norm / deg into the message (each edge hits exactly one row of
    # the scatter matrix, so this is equivalent to weighting S), then go bf16
    # so the scatter matmul runs on the fast MXU path.
    msg_bf = (msg * coef_ref[...]).astype(jnp.bfloat16)             # [tile_E, D]

    # ---- scatter-mean: 0/1 select block built in-kernel (no [N,E] in HBM) ----
    n0 = pl.program_id(0) * tile_n
    node_ids = n0 + jax.lax.broadcasted_iota(jnp.int32, (tile_n, tile_e), 0)
    s_block = (dst_ref[...] == node_ids).astype(jnp.bfloat16)       # [tile_N, tile_E]
    acc_ref[...] += jnp.dot(s_block, msg_bf,
                            preferred_element_type=jnp.float32)

    # ---- epilogue: single store per N tile ----
    @pl.when(e_idx == pl.num_programs(1) - 1)
    def _finalize():
        o_ref[...] = acc_ref[...].astype(o_ref.dtype)


def rgcn_forward(entity, edge_index, edge_type, edge_norm, params,
                 *, tile_n=256, tile_e=512):
    """JAX/Pallas equivalent of RGCN.forward (embedding lookup + RGCNConv, aggr='mean')."""
    emb_table = params["entity_embedding"]        # [num_entities, D]
    basis = params["basis"]                       # [B, D, D]
    att = params["att"]                           # [R, B]
    root = params["root"]                         # [D, D]
    bias = params["bias"]                         # [D]

    R, B = att.shape
    D = basis.shape[1]

    # --- glue (plain JAX) ---
    x = emb_table[entity]                                           # [N, D]
    # TODO(synk): the x[src] gather could be fused into the kernel via a manual
    # DMA row gather; kept as an XLA gather here for simplicity/robustness.
    N = x.shape[0]
    E = int(edge_type.shape[0])

    # Basis decomposition W[r] = sum_b att[r,b]*basis[b]; concat along output
    # lanes: W_cat[k, r*D + d] = W[r, k, d]  -> [D, R*D] (lane-dense message path).
    w = jnp.matmul(att, basis.reshape(B, -1)).reshape(R, D, D)
    w_cat = jnp.transpose(w, (1, 0, 2)).reshape(D, R * D)

    src = edge_index[0]
    dst = edge_index[1].astype(jnp.int32)
    xj = x[src]                                                     # [E, D]

    en = (jnp.ones((E,), jnp.float32) if edge_norm is None
          else edge_norm.astype(jnp.float32))
    deg = jax.ops.segment_sum(jnp.ones((E,), jnp.float32), dst, num_segments=N)
    coef = en / jnp.maximum(deg[dst], 1.0)                          # [E]

    # --- padding to tile multiples (padded edges: dst=-1, coef=0 -> no effect) ---
    tile_n = min(tile_n, _round_up(N, 8))
    tile_e = min(tile_e, _round_up(E, 8))
    n_pad = _round_up(N, tile_n)
    e_pad = _round_up(E, tile_e)
    num_n = n_pad // tile_n
    num_e = e_pad // tile_e

    x_p = jnp.zeros((n_pad, D), jnp.float32).at[:N].set(x)
    xj_p = jnp.zeros((e_pad, D), jnp.float32).at[:E].set(xj)
    et_p = jnp.zeros((e_pad, 1), jnp.int32).at[:E, 0].set(edge_type.astype(jnp.int32))
    dst_p = jnp.full((e_pad,), -1, jnp.int32).at[:E].set(dst)
    coef_p = jnp.zeros((e_pad, 1), jnp.float32).at[:E, 0].set(coef)

    dst3 = dst_p.reshape(num_e, 1, tile_e)                          # [T, 1, tile_E]

    # bf16 matmul inputs, f32 accumulation inside the kernel.
    xj_bf = xj_p.astype(jnp.bfloat16)
    x_bf = x_p.astype(jnp.bfloat16)
    wcat_bf = w_cat.astype(jnp.bfloat16)
    root_bf = root.astype(jnp.bfloat16)
    bias2 = bias.reshape(1, D).astype(jnp.float32)

    kernel = functools.partial(rgcn_kernel, num_relations=R, out_dim=D,
                               tile_n=tile_n)

    flops = (2 * num_n * e_pad * D * (R * D)     # message matmuls (recomputed per N tile)
             + 2 * n_pad * e_pad * D             # scatter-mean matmuls
             + 2 * n_pad * D * D)                # root transform
    bytes_accessed = (num_n * (xj_bf.size * 2 + et_p.size * 4
                               + dst3.size * 4 + coef_p.size * 4)
                      + x_bf.size * 2 + wcat_bf.size * 2 + root_bf.size * 2
                      + bias2.size * 4 + n_pad * D * 4)

    out = pl.pallas_call(
        kernel,
        out_shape=jax.ShapeDtypeStruct((n_pad, D), jnp.float32),
        grid_spec=pltpu.PrefetchScalarGridSpec(
            num_scalar_prefetch=0,
            grid=(num_n, num_e),
            in_specs=[
                pl.BlockSpec((tile_e, D), lambda i, e: (e, 0)),            # xj
                pl.BlockSpec((tile_e, 1), lambda i, e: (e, 0)),            # edge_type
                pl.BlockSpec((None, 1, tile_e), lambda i, e: (e, 0, 0)),   # dst
                pl.BlockSpec((tile_e, 1), lambda i, e: (e, 0)),            # coef = norm/deg
                pl.BlockSpec((D, R * D), lambda i, e: (0, 0)),             # W concat
                pl.BlockSpec((tile_n, D), lambda i, e: (i, 0)),            # x
                pl.BlockSpec((D, D), lambda i, e: (0, 0)),                 # root
                pl.BlockSpec((1, D), lambda i, e: (0, 0)),                 # bias
            ],
            out_specs=pl.BlockSpec((tile_n, D), lambda i, e: (i, 0)),
            scratch_shapes=[pltpu.VMEM((tile_n, D), jnp.float32)],
        ),
        compiler_params=pltpu.CompilerParams(
            dimension_semantics=("parallel", "arbitrary"),
            vmem_limit_bytes=48 * 1024 * 1024,
        ),
        cost_estimate=pl.CostEstimate(flops=flops, transcendentals=0,
                                      bytes_accessed=bytes_accessed),
    )(xj_bf, et_p, dst3, coef_p, wcat_bf, x_bf, root_bf, bias2)

    return out[:N]


def rgcn_reference(entity, edge_index, edge_type, edge_norm, params):
    """Pure-JAX f32 reference mirroring RGCNConv (aggr='mean') semantics."""
    x = params["entity_embedding"][entity]
    basis, att = params["basis"], params["att"]
    R, B = att.shape
    D = basis.shape[1]
    w = jnp.matmul(att, basis.reshape(B, -1)).reshape(R, D, D)
    src, dst = edge_index[0], edge_index[1]
    xj = x[src]
    w_e = w[edge_type]                                              # [E, D, D]
    msg = jnp.einsum("ed,edo->eo", xj, w_e)
    if edge_norm is not None:
        msg = msg * edge_norm[:, None]
    N = x.shape[0]
    summed = jax.ops.segment_sum(msg, dst, num_segments=N)
    cnt = jax.ops.segment_sum(jnp.ones((edge_type.shape[0],), jnp.float32),
                              dst, num_segments=N)
    aggr = summed / jnp.maximum(cnt, 1.0)[:, None]
    return aggr + x @ params["root"] + params["bias"][None, :]


if __name__ == "__main__":
    # Small deterministic problem consistent with the module's constructor:
    # RGCN(num_entities=10, num_relations=2, num_bases=2, embedding_size=32, dropout=0.2)
    num_entities = 10
    num_relations = 2            # conv uses num_relations * 2 edge types
    num_bases = 2
    embedding_size = 32
    R = num_relations * 2
    N = 8                        # number of nodes in this graph
    E = 16                       # number of edges

    key = jax.random.PRNGKey(0)
    keys = jax.random.split(key, 10)

    params = {
        "entity_embedding": jax.random.normal(keys[0], (num_entities, embedding_size), jnp.float32),
        "basis": jax.random.normal(keys[1], (num_bases, embedding_size, embedding_size), jnp.float32) * 0.1,
        "att": jax.random.normal(keys[2], (R, num_bases), jnp.float32) * 0.1,
        "root": jax.random.normal(keys[3], (embedding_size, embedding_size), jnp.float32) * 0.1,
        "bias": jax.random.normal(keys[4], (embedding_size,), jnp.float32) * 0.1,
    }
    # TODO(synk): dropout_ratio is stored but never applied in RGCN.forward, so it is omitted.

    entity = jax.random.randint(keys[5], (N,), 0, num_entities)
    edge_index = jax.random.randint(keys[6], (2, E), 0, N)
    edge_type = jax.random.randint(keys[7], (E,), 0, R)
    edge_norm = jax.random.uniform(keys[8], (E,), jnp.float32, 0.1, 1.0)

    out = rgcn_forward(entity, edge_index, edge_type, edge_norm, params)
    out = jax.block_until_ready(out)

    ref = rgcn_reference(entity, edge_index, edge_type, edge_norm, params)
    assert out.shape == (N, embedding_size)
    # bf16 matmul inputs (f32 accumulation) -> compare with a loosened tolerance.
    assert jnp.allclose(out, ref, atol=3e-2, rtol=3e-2), "Pallas kernel mismatch vs reference"

    print("KERNEL_OK")
</pallas_src>

<mosaic_0001>
module attributes {stable_mosaic.version = 11 : i64} {
  func.func @rgcn_kernel(%arg0: i32, %arg1: i32, %arg2: memref<16x32xbf16, #tpu.memory_space<vmem>>, %arg3: memref<16x1xi32, #tpu.memory_space<vmem>>, %arg4: memref<1x1x16xi32, #tpu.memory_space<vmem>>, %arg5: memref<16x1xf32, #tpu.memory_space<vmem>>, %arg6: memref<32x128xbf16, #tpu.memory_space<vmem>>, %arg7: memref<8x32xbf16, #tpu.memory_space<vmem>>, %arg8: memref<32x32xbf16, #tpu.memory_space<vmem>>, %arg9: memref<1x32xf32, #tpu.memory_space<vmem>>, %arg10: memref<8x32xf32, #tpu.memory_space<vmem>>, %arg11: memref<8x32xf32, #tpu.memory_space<vmem>>) attributes {dimension_semantics = [#tpu.dimension_semantics<parallel>, #tpu.dimension_semantics<arbitrary>], iteration_bounds = array<i64: 1, 1>, scalar_prefetch = 0 : i64, scratch_operands = 1 : i64, tpu.core_type = #tpu.core_type<tc>, window_params = [{transform_indices = @transform_0, window_bounds = array<i64: 16, 32>}, {transform_indices = @transform_1, window_bounds = array<i64: 16, 1>}, {transform_indices = @transform_2, window_bounds = array<i64: 1, 1, 16>}, {transform_indices = @transform_3, window_bounds = array<i64: 16, 1>}, {pipeline_mode = #tpu.pipeline_mode<synchronous>, transform_indices = @transform_4, window_bounds = array<i64: 32, 128>}, {transform_indices = @transform_5, window_bounds = array<i64: 8, 32>}, {pipeline_mode = #tpu.pipeline_mode<synchronous>, transform_indices = @transform_6, window_bounds = array<i64: 32, 32>}, {pipeline_mode = #tpu.pipeline_mode<synchronous>, transform_indices = @transform_7, window_bounds = array<i64: 1, 32>}, {transform_indices = @transform_8, window_bounds = array<i64: 8, 32>}]} {
    %c0_i32 = arith.constant 0 : i32
    %0 = arith.cmpi eq, %arg1, %c0_i32 : i32
    %1 = arith.extui %0 : i1 to i32
    %c0_i32_0 = arith.constant 0 : i32
    %2 = arith.cmpi ne, %1, %c0_i32_0 : i32
    scf.if %2 {
      %c0_20 = arith.constant 0 : index
      %c0_21 = arith.constant 0 : index
      %62 = vector.load %arg7[%c0_20, %c0_21] : memref<8x32xbf16, #tpu.memory_space<vmem>>, vector<8x32xbf16>
      %c0_22 = arith.constant 0 : index
      %c0_23 = arith.constant 0 : index
      %63 = vector.load %arg8[%c0_22, %c0_23] : memref<32x32xbf16, #tpu.memory_space<vmem>>, vector<32x32xbf16>
      %cst_24 = arith.constant dense<0.000000e+00> : vector<8x32xf32>
      %64 = tpu.matmul %62, %63, %cst_24 {dimension_numbers = #tpu.dot_dimension_numbers<[1], [0], [0], [1], [0, 0, 1, 1], [], []>} : vector<8x32xbf16>, vector<32x32xbf16>, vector<8x32xf32> -> vector<8x32xf32>
      %c0_25 = arith.constant 0 : index
      %c0_26 = arith.constant 0 : index
      %65 = vector.load %arg9[%c0_25, %c0_26] : memref<1x32xf32, #tpu.memory_space<vmem>>, vector<1x32xf32>
      %66 = vector.broadcast %65 : vector<1x32xf32> to vector<8x32xf32>
      %67 = arith.addf %64, %66 : vector<8x32xf32>
      %c0_27 = arith.constant 0 : index
      %c0_28 = arith.constant 0 : index
      %68 = vector.load %arg11[%c0_27, %c0_28] : memref<8x32xf32, #tpu.memory_space<vmem>>, vector<8x32xf32>
      tpu.vector_store %arg11[%c0_27, %c0_28], %67 {strides = array<i32>} : memref<8x32xf32, #tpu.memory_space<vmem>>, vector<8x32xf32>,
    } else {
    }
    %c0 = arith.constant 0 : index
    %c0_1 = arith.constant 0 : index
    %3 = vector.load %arg2[%c0, %c0_1] : memref<16x32xbf16, #tpu.memory_space<vmem>>, vector<16x32xbf16>
    %c0_2 = arith.constant 0 : index
    %c0_3 = arith.constant 0 : index
    %4 = vector.load %arg6[%c0_2, %c0_3] : memref<32x128xbf16, #tpu.memory_space<vmem>>, vector<32x128xbf16>
    %cst = arith.constant dense<0.000000e+00> : vector<16x128xf32>
    %5 = tpu.matmul %3, %4, %cst {dimension_numbers = #tpu.dot_dimension_numbers<[1], [0], [0], [1], [0, 0, 1, 1], [], []>} : vector<16x32xbf16>, vector<32x128xbf16>, vector<16x128xf32> -> vector<16x128xf32>
    %c0_4 = arith.constant 0 : index
    %c0_5 = arith.constant 0 : index
    %6 = vector.load %arg3[%c0_4, %c0_5] : memref<16x1xi32, #tpu.memory_space<vmem>>, vector<16x1xi32>
    %cst_6 = arith.constant 0.000000e+00 : f32
    %7 = vector.broadcast %cst_6 : f32 to vector<16x32xf32>
    %c0_i32_7 = arith.constant 0 : i32
    %8 = vector.broadcast %c0_i32_7 : i32 to vector<16x1xi32>
    %9 = arith.cmpi eq, %6, %8 : vector<16x1xi32>
    %10 = arith.extui %9 : vector<16x1xi1> to vector<16x1xi32>
    %11 = arith.sitofp %10 : vector<16x1xi32> to vector<16x1xf32>
    %12 = vector.extract_strided_slice %5 {offsets = [0, 0], sizes = [16, 32], strides = [1, 1]} : vector<16x128xf32> to vector<16x32xf32>
    %13 = vector.broadcast %11 : vector<16x1xf32> to vector<16x32xf32>
    %14 = arith.mulf %13, %12 : vector<16x32xf32>
    %15 = arith.addf %7, %14 : vector<16x32xf32>
    %c1_i32 = arith.constant 1 : i32
    %16 = vector.broadcast %c1_i32 : i32 to vector<16x1xi32>
    %17 = arith.cmpi eq, %6, %16 : vector<16x1xi32>
    %18 = arith.extui %17 : vector<16x1xi1> to vector<16x1xi32>
    %19 = arith.sitofp %18 : vector<16x1xi32> to vector<16x1xf32>
    %20 = vector.extract_strided_slice %5 {offsets = [0, 32], sizes = [16, 32], strides = [1, 1]} : vector<16x128xf32> to vector<16x32xf32>
    %21 = vector.broadcast %19 : vector<16x1xf32> to vector<16x32xf32>
    %22 = arith.mulf %21, %20 : vector<16x32xf32>
    %23 = arith.addf %15, %22 : vector<16x32xf32>
    %c2_i32 = arith.constant 2 : i32
    %24 = vector.broadcast %c2_i32 : i32 to vector<16x1xi32>
    %25 = arith.cmpi eq, %6, %24 : vector<16x1xi32>
    %26 = arith.extui %25 : vector<16x1xi1> to vector<16x1xi32>
    %27 = arith.sitofp %26 : vector<16x1xi32> to vector<16x1xf32>
    %28 = vector.extract_strided_slice %5 {offsets = [0, 64], sizes = [16, 32], strides = [1, 1]} : vector<16x128xf32> to vector<16x32xf32>
    %29 = vector.broadcast %27 : vector<16x1xf32> to vector<16x32xf32>
    %30 = arith.mulf %29, %28 : vector<16x32xf32>
    %31 = arith.addf %23, %30 : vector<16x32xf32>
    %c3_i32 = arith.constant 3 : i32
    %32 = vector.broadcast %c3_i32 : i32 to vector<16x1xi32>
    %33 = arith.cmpi eq, %6, %32 : vector<16x1xi32>
    %34 = arith.extui %33 : vector<16x1xi1> to vector<16x1xi32>
    %35 = arith.sitofp %34 : vector<16x1xi32> to vector<16x1xf32>
    %36 = vector.extract_strided_slice %5 {offsets = [0, 96], sizes = [16, 32], strides = [1, 1]} : vector<16x128xf32> to vector<16x32xf32>
    %37 = vector.broadcast %35 : vector<16x1xf32> to vector<16x32xf32>
    %38 = arith.mulf %37, %36 : vector<16x32xf32>
    %39 = arith.addf %31, %38 : vector<16x32xf32>
    %c0_8 = arith.constant 0 : index
    %c0_9 = arith.constant 0 : index
    %40 = vector.load %arg5[%c0_8, %c0_9] : memref<16x1xf32, #tpu.memory_space<vmem>>, vector<16x1xf32>
    %41 = vector.broadcast %40 : vector<16x1xf32> to vector<16x32xf32>
    %42 = arith.mulf %39, %41 : vector<16x32xf32>
    %43 = arith.truncf %42 : vector<16x32xf32> to vector<16x32xbf16>
    %c8_i32 = arith.constant 8 : i32
    %44 = arith.muli %arg0, %c8_i32 : i32
    %45 = tpu.iota {dimensions = array<i32: 0>} : vector<8x16xi32>
    %46 = vector.broadcast %44 : i32 to vector<8x16xi32>
    %47 = arith.addi %46, %45 : vector<8x16xi32>
    %c0_10 = arith.constant 0 : index
    %c0_11 = arith.constant 0 : index
    %c0_12 = arith.constant 0 : index
    %48 = vector.load %arg4[%c0_10, %c0_11, %c0_12] : memref<1x1x16xi32, #tpu.memory_space<vmem>>, vector<1x1x16xi32>
    %49 = vector.shape_cast %48 : vector<1x1x16xi32> to vector<1x16xi32>
    %50 = vector.broadcast %49 : vector<1x16xi32> to vector<8x16xi32>
    %51 = arith.cmpi eq, %50, %47 : vector<8x16xi32>
    %52 = arith.extui %51 : vector<8x16xi1> to vector<8x16xi32>
    %53 = arith.sitofp %52 : vector<8x16xi32> to vector<8x16xf32>
    %54 = arith.truncf %53 : vector<8x16xf32> to vector<8x16xbf16>
    %c0_13 = arith.constant 0 : index
    %c0_14 = arith.constant 0 : index
    %55 = vector.load %arg11[%c0_13, %c0_14] : memref<8x32xf32, #tpu.memory_space<vmem>>, vector<8x32xf32>
    %cst_15 = arith.constant dense<0.000000e+00> : vector<8x32xf32>
    %56 = tpu.matmul %54, %43, %cst_15 {dimension_numbers = #tpu.dot_dimension_numbers<[1], [0], [0], [1], [0, 0, 1, 1], [], []>} : vector<8x16xbf16>, vector<16x32xbf16>, vector<8x32xf32> -> vector<8x32xf32>
    %57 = arith.addf %55, %56 : vector<8x32xf32>
    %c0_16 = arith.constant 0 : index
    %c0_17 = arith.constant 0 : index
    %58 = vector.load %arg11[%c0_16, %c0_17] : memref<8x32xf32, #tpu.memory_space<vmem>>, vector<8x32xf32>
    tpu.vector_store %arg11[%c0_16, %c0_17], %57 {strides = array<i32>} : memref<8x32xf32, #tpu.memory_space<vmem>>, vector<8x32xf32>,
    %c0_i32_18 = arith.constant 0 : i32
    %59 = arith.cmpi eq, %arg1, %c0_i32_18 : i32
    %60 = arith.extui %59 : i1 to i32
    %c0_i32_19 = arith.constant 0 : i32
    %61 = arith.cmpi ne, %60, %c0_i32_19 : i32
    scf.if %61 {
      %c0_20 = arith.constant 0 : index
      %c0_21 = arith.constant 0 : index
      %62 = vector.load %arg11[%c0_20, %c0_21] : memref<8x32xf32, #tpu.memory_space<vmem>>, vector<8x32xf32>
      %c0_22 = arith.constant 0 : index
      %c0_23 = arith.constant 0 : index
      %63 = vector.load %arg10[%c0_22, %c0_23] : memref<8x32xf32, #tpu.memory_space<vmem>>, vector<8x32xf32>
      tpu.vector_store %arg10[%c0_22, %c0_23], %62 {strides = array<i32>} : memref<8x32xf32, #tpu.memory_space<vmem>>, vector<8x32xf32>,
    } else {
    }
    return
  }
  func.func @transform_0(%arg0: i32, %arg1: i32) -> (i32, i32) {
    %c0_i32 = arith.constant 0 : i32
    %c0_i32_0 = arith.constant 0 : i32
    return %arg1, %c0_i32 : i32, i32
  }
  func.func @transform_1(%arg0: i32, %arg1: i32) -> (i32, i32) {
    %c0_i32 = arith.constant 0 : i32
    %c0_i32_0 = arith.constant 0 : i32
    return %arg1, %c0_i32 : i32, i32
  }
  func.func @transform_2(%arg0: i32, %arg1: i32) -> (i32, i32, i32) {
    %c0_i32 = arith.constant 0 : i32
    %c0_i32_0 = arith.constant 0 : i32
    %c0_i32_1 = arith.constant 0 : i32
    return %arg1, %c0_i32, %c0_i32_0 : i32, i32, i32
  }
  func.func @transform_3(%arg0: i32, %arg1: i32) -> (i32, i32) {
    %c0_i32 = arith.constant 0 : i32
    %c0_i32_0 = arith.constant 0 : i32
    return %arg1, %c0_i32 : i32, i32
  }
  func.func @transform_4(%arg0: i32, %arg1: i32) -> (i32, i32) {
    %c0_i32 = arith.constant 0 : i32
    %c0_i32_0 = arith.constant 0 : i32
    %c0_i32_1 = arith.constant 0 : i32
    return %c0_i32, %c0_i32_0 : i32, i32
  }
  func.func @transform_5(%arg0: i32, %arg1: i32) -> (i32, i32) {
    %c0_i32 = arith.constant 0 : i32
    %c0_i32_0 = arith.constant 0 : i32
    return %arg0, %c0_i32 : i32, i32
  }
  func.func @transform_6(%arg0: i32, %arg1: i32) -> (i32, i32) {
    %c0_i32 = arith.constant 0 : i32
    %c0_i32_0 = arith.constant 0 : i32
    %c0_i32_1 = arith.constant 0 : i32
    return %c0_i32, %c0_i32_0 : i32, i32
  }
  func.func @transform_7(%arg0: i32, %arg1: i32) -> (i32, i32) {
    %c0_i32 = arith.constant 0 : i32
    %c0_i32_0 = arith.constant 0 : i32
    %c0_i32_1 = arith.constant 0 : i32
    return %c0_i32, %c0_i32_0 : i32, i32
  }
  func.func @transform_8(%arg0: i32, %arg1: i32) -> (i32, i32) {
    %c0_i32 = arith.constant 0 : i32
    %c0_i32_0 = arith.constant 0 : i32
    return %arg0, %c0_i32 : i32, i32
  }
}

</mosaic_0001>

<bundles_post_ra>
// kernel: tpu_custom_call.1
= control target key start
LH: loop header
LB: loop body
LE: loop exit
PB: predicated region body
PF: predicated region fallthrough
CT: control target
= control target key end

     0   :  { %13 = vsyncpa [#allocation4], 0  ;;  %s661_s0 = inlined_call_operand.hbm [shape: bf16[16,32], index: 0, kind: input, shape index: {}]   ;;  %s662_s1 = inlined_call_operand.vmem [shape: s32[16,1], index: 1, kind: input, shape index: {}]   ;;  %s663_s2 = inlined_call_operand.vmem [shape: s32[1,1,16], index: 2, kind: input, shape index: {}]   ;;  %s664_s3 = inlined_call_operand.vmem [shape: f32[16,1], index: 3, kind: input, shape index: {}]   ;;  %s665_s4 = inlined_call_operand.vmem [shape: bf16[32,128], index: 4, kind: input, shape index: {}]   ;;  %s666_s5 = inlined_call_operand.vmem [shape: bf16[8,32], index: 5, kind: input, shape index: {}]   ;;  %s667_s6 = inlined_call_operand.vmem [shape: bf16[32,32], index: 6, kind: input, shape index: {}]   ;;  %s668_s7 = inlined_call_operand.vmem [shape: f32[1,32], index: 7, kind: input, shape index: {}]   ;;  %s669_s8 = inlined_call_operand.hbm [shape: f32[8,32], index: 8, kind: output, shape index: {}]  }
   0x1   :  { %14 = vsyncpa [#allocation5], 0  ;;  %s521_s27 = smov [#allocation3]   ;;  %s473_s9 = scalar_lea.hbm %s661_s0, 128 }
   0x2   :  { %s20_s28 = sshll.u32 %s521_s27, 4  ;;  %p474_p0 = scmp.ne.s32.totalorder %s661_s0, %s473_s9  ;;  %s21_s28 = int_to_ptr.vmem [resolvable:$true] %s20_s28 }
   0x3   :  { %p477_p1 = scmp.lt.u32.totalorder %s473_s9, %s661_s0 }
   0x5   :  { %p479_p2 = pnand %p477_p1, %p474_p0 }
   0x7   :  { %482 = shalt.err (!%p479_p2)
}
   0x8   :  { %s483_s14 = scalar_lea.vmem %s21_s28, 128  ;;  %p488_p4 = scmp.lt.s32.totalorder %s21_s28, %s21_s28 }
   0x9   :  { %p484_p3 = scmp.ne.s32.totalorder %s21_s28, %s483_s14  ;;  %p489_p5 = scmp.lt.s32.totalorder %s483_s14, %s483_s14 }
   0xb   :  { %p490_p6 = por %p489_p5, %p488_p4 }
   0xd   :  { %p491_p7 = pnand %p490_p6, %p484_p3 }
   0xf   :  { %494 = shalt.err (!%p491_p7)
}
  0x10   :  { %s522_s15 = smov 64   ;;  %s523_s16 = smov 4  }
  0x11   :  { %26 = dma.hbm_to_vmem [thread:$0]  %s661_s0, 128, %s21_s28, [#allocation4], %s522_s15, %s522_s15, %s523_s16  }
  0x12   :  { %517 = dma.done.wait [#allocation4], 128  }
  0x13   :  { %518 = vsyncadd [#allocation4], 4294967168  ;;  %v524_v0 = vmov 0.0   ;;  %vm525_vm0 = vmmov 0   ;;  %v526_v1 = vmov 0   ;;  %v468_v2 = vld [vmem:[%s665_s4] sm:$0xff]   ;;  %v308_v50 = vlaneseq }
  0x14   :  { %423 = vmatprep.subr.bf16.mxu1 %v524_v0  ;;  %427 = vmatprep.mubr.msk.bf16.mxu1 %vm525_vm0, %v524_v0  ;;  %v469_v3 = vld [vmem:[%s665_s4 + $0x8] sm:$0xff]   ;;  %vm73_vm1 = vcmask 261120   ;;  %v186_v4 = vld [vmem:[%s662_s1] sm:$0xff]  ;;  %vm322_vm11 = vcmask 130048  }
  0x15   :  { %446 = vset.pattern.permute.xlu0 %v526_v1  ;;  %457 = vset.pattern.permute.xlu1 %v526_v1  ;;  %v187_v5 = vld [vmem:[%s662_s1 + $0x8] sm:$0xff]  ;;  %vm208_vm2 = vcmp.eq.s32.totalorder %v186_v4, 1  ;;  %vm264_vm4 = vcmp.eq.s32.totalorder %v186_v4, 3  ;;  %vm236_vm6 = vcmp.eq.s32.totalorder %v186_v4, 2  ;;  %vm188_vm8 = vcmp.eq.s32.totalorder %v186_v4, 0  ;;  %v292_v19 = vld [vmem:[%s664_s3] sm:$0xff] }
  0x16   :  { %415 = vmatprep.subr.bf16.mxu0 %v524_v0  ;;  %419 = vmatprep.mubr.msk.bf16.mxu0 %vm525_vm0, %v524_v0  ;;  %v470_v6 = vld [vmem:[#allocation3] sm:$0xff]   ;;  %vm209_vm3 = vcmp.eq.s32.totalorder %v187_v5, 1  ;;  %vm265_vm5 = vcmp.eq.s32.totalorder %v187_v5, 3  ;;  %v398_v7 = vsel %vm208_vm2, 1.0, %v524_v0  ;;  %v402_v9 = vsel %vm264_vm4, 1.0, %v524_v0  ;;  %v471_v21 = vld [vmem:[%s667_s6] sm:$0xff]  }
  0x17   :  { %424 = vmatpush3.bf16.msra.mxu1 %v468_v2  ;;  %v399_v8 = vsel %vm209_vm3, 1.0, %v524_v0  ;;  %v403_v10 = vsel %vm265_vm5, 1.0, %v524_v0  ;;  %vm237_vm7 = vcmp.eq.s32.totalorder %v187_v5, 2  ;;  %v400_v13 = vsel %vm236_vm6, 1.0, %v524_v0  ;;  %v293_v20 = vld [vmem:[%s664_s3 + $0x8] sm:$0xff]  ;;  %416 = vmatpush3.bf16.msra.mxu0 %v471_v21  ;;  %s527_s3 = smov 96  }
  0x18   :  { %425 = vmatprep.subr.bf16.mxu1 %v524_v0  ;;  %v447_v11 = vpack.i.bf16 %v399_v8, %v398_v7  ;;  %v458_v12 = vpack.i.bf16 %v403_v10, %v402_v9  ;;  %v401_v14 = vsel %vm237_vm7, 1.0, %v524_v0  ;;  %vm189_vm9 = vcmp.eq.s32.totalorder %v187_v5, 0  ;;  %417 = vmatprep.subr.bf16.mxu0 %v524_v0  ;;  %v472_v22 = vld [vmem:[%s667_s6 + $0x8] sm:$0xff]   ;;  %v49_v24 = vld [vmem:[%s666_s5] sm:$0xf]  ;;  %s528_s5 = smov 32  }
  0x19   :  { %v452_v15 = vpack.i.bf16 %v401_v14, %v400_v13  ;;  %v396_v16 = vsel %vm188_vm8, 1.0, %v524_v0  ;;  %v397_v17 = vsel %vm189_vm9, 1.0, %v524_v0  ;;  %v309_v56 = vshrl.u32 %v308_v50, 7  ;;  %v404_v59 = vld [vmem:[%s663_s2] ss:$0 sm:$0xff]  ;;  %s529_s2 = smov [#allocation6]  }
  0x1a   :  { %448 = vperm.xlu0 %446, %v447_v11   ;;  %459 = vperm.xlu1 %457, %v458_v12   ;;  %v463_v18 = vpack.i.bf16 %v397_v17, %v396_v16  ;;  %v388_v7 = vld [vmem:[%s668_s7] ss:$0 sm:$0xff] }
  0x1b   :  { %426 = vmatpush3.bf16.msra.mxu1 %v469_v3  ;;  %418 = vmatpush3.bf16.msra.mxu0 %v472_v22  ;;  %vm317_vm10 = vcmp.eq.s32.totalorder %v404_v59, %v309_v56 }
  0x1c   :  { %431 = vmatprep.subr.bf16.mxu0 %v524_v0  ;;  %v405_v4 = vsel %vm317_vm10, 1.0, %v524_v0 }
  0x1e   :  { %428 = vmatmul.mubr.msk.bf16.vlgmr.msra.gmra.mrb[0].mxu1 %vm73_vm1, %v470_v6  ;;  %453 = vperm.xlu0 %446, %v452_v15   ;;  %v320_v6 = vpack.c.bf16 %v405_v4, %v405_v4 }
  0x1f   :  { %464 = vperm.xlu1 %457, %v463_v18   ;;  %420 = vmatmul.mubr.msk.bf16.vlgmr.msra.gmra.mrb[0].mxu0 %vm73_vm1, %v49_v24 }
  0x20   :  { %433 = vmatprep.mubr.msk.bf16.mxu0 %vm525_vm0, %v524_v0 }
  0x22   :  { %296 = vperm.xlu0 %446, %v292_v19  }
  0x23   :  { %301 = vperm.xlu1 %457, %v293_v20  }
  0x99   :  { %v449_v23 = vpop.permute.xlu0 %448  ;;  %v460_v36 = vpop.permute.xlu1 %459 }
  0x9a   :  { %v450_v25 = vunpack.i.l.bf16 %v449_v23  ;;  %v451_v26 = vunpack.i.h.bf16 %v449_v23  ;;  %v461_v37 = vunpack.i.l.bf16 %v460_v36  ;;  %v462_v39 = vunpack.i.h.bf16 %v460_v36 }
  0x9d   :  { %v454_v27 = vpop.permute.xlu0 %453 }
  0x9e   :  { %v455_v29 = vunpack.i.l.bf16 %v454_v27  ;;  %v456_v33 = vunpack.i.h.bf16 %v454_v27  ;;  %v465_v43 = vpop.permute.xlu1 %464 }
  0x9f   :  { %v466_v46 = vunpack.i.l.bf16 %v465_v43  ;;  %v467_v48 = vunpack.i.h.bf16 %v465_v43 }
  0xa1   :  { %v297_v44 = vpop.permute.xlu0 %296 }
  0xa2   :  { %v302_v45 = vpop.permute.xlu1 %301 }
  0xf1   :  { %v179_v28 = vpop.f32.mrb[0].mxu1 }
  0xf2   :  { %v429_v30 = vpop.f32.mrb[1].mxu1  ;;  %v224_v31 = vmul.f32 %v450_v25, %v179_v28  ;;  %v252_v38 = vmul.f32 %v455_v29, %v179_v28  ;;  %v280_v41 = vmul.f32 %v461_v37, %v179_v28  ;;  %v204_v51 = vmul.f32 %v466_v46, %v179_v28  ;;  %v111_v8 = vpop.f32.mrb[0].mxu0 }
  0xf3   :  { %v182_v32 = vpop.f32.mrb[2].mxu1  ;;  %v112_v9 = vadd.f32 %v388_v7, %v111_v8  ;;  %v421_v10 = vpop.f32.mrb[1].mxu0 }
  0xf4   :  { %228 = vrot.lane.b32.xlu0 %v224_v31, %s527_s3  ;;  %v430_v34 = vpop.f32.mrb[3].mxu1  ;;  %v225_v35 = vmul.f32 %v451_v26, %v182_v32  ;;  %v253_v40 = vmul.f32 %v456_v33, %v182_v32  ;;  %v281_v42 = vmul.f32 %v462_v39, %v182_v32  ;;  %v205_v54 = vmul.f32 %v467_v48, %v182_v32  ;;  %v114_v11 = vpop.f32.mrb[2].mxu0 }
  0xf5   :  { %117 = vst.msk [vmem:[#allocation2] sm:$0xff] %vm73_vm1, %v112_v9  ;;  %v422_v12 = vpop.f32.mrb[3].mxu0 }
  0xf6   :  { %230 = vrot.lane.b32.xlu1 %v225_v35, %s527_s3 }
  0xf8   :  { %256 = vrot.lane.b32.xlu0 %v252_v38, %s522_s15 }
  0xfa   :  { %258 = vrot.lane.b32.xlu1 %v253_v40, %s522_s15  ;;  %s379_s15 = sshll.u32 %s529_s2, 4  ;;  %s380_s15 = int_to_ptr.vmem [resolvable:$true] %s379_s15 }
  0xfb   :  { %s495_s7 = scalar_lea.vmem %s380_s15, 128  ;;  %p500_p9 = scmp.lt.s32.totalorder %s380_s15, %s380_s15 }
  0xfc   :  { %284 = vrot.lane.b32.xlu0 %v280_v41, %s528_s5  ;;  %v321_v13 = vld [vmem:[#allocation2] sm:$0xff]  ;;  %p496_p8 = scmp.ne.s32.totalorder %s380_s15, %s495_s7  ;;  %p501_p10 = scmp.lt.s32.totalorder %s495_s7, %s495_s7 }
  0xfe   :  { %286 = vrot.lane.b32.xlu1 %v281_v42, %s528_s5  ;;  %p502_p11 = por %p501_p10, %p500_p9 }
 0x100   :  { %p503_p12 = pnand %p502_p11, %p496_p8 }
 0x166   :  { %v229_v47 = vpop.permute.xlu0 %228 }
 0x167   :  { %v234_v53 = vadd.f32 %v229_v47, %v204_v51 }
 0x168   :  { %v231_v49 = vpop.permute.xlu1 %230 }
 0x169   :  { %v235_v57 = vadd.f32 %v231_v49, %v205_v54 }
 0x16a   :  { %v257_v52 = vpop.permute.xlu0 %256 }
 0x16b   :  { %v262_v58 = vadd.f32 %v257_v52, %v234_v53 }
 0x16c   :  { %v259_v55 = vpop.permute.xlu1 %258 }
 0x16d   :  { %v263_v61 = vadd.f32 %v259_v55, %v235_v57 }
 0x16e   :  { %v285_v60 = vpop.permute.xlu0 %284 }
 0x16f   :  { %v290_v62 = vadd.f32 %v285_v60, %v262_v58 }
 0x170   :  { %v287_v63 = vpop.permute.xlu1 %286 }
 0x171   :  { %v291_v1 = vadd.f32 %v287_v63, %v263_v61  ;;  %v304_v2 = vmul.f32 %v297_v44, %v290_v62 }
 0x173   :  { %v305_v3 = vmul.f32 %v302_v45, %v291_v1 }
 0x175   :  { %v306_v5 = vpack.c.bf16 %v305_v3, %v304_v2 }
 0x177   :  { %432 = vmatpush3.bf16.msra.mxu0 %v306_v5 }
 0x17a   :  { %434 = vmatmul.mubr.msk.bf16.vlgmr.msra.gmra.mrb[4].mxu0 %vm322_vm11, %v320_v6 }
 0x24d   :  { %v360_v14 = vpop.f32.mrb[4].mxu0 }
 0x24e   :  { %v366_v15 = vadd.f32 %v360_v14, %v321_v13  ;;  %v435_v0 = vpop.f32.mrb[5].mxu0 }
 0x24f   :  { %v363_v16 = vpop.f32.mrb[6].mxu0 }
 0x250   :  { %367 = vst.msk [vmem:[#allocation2] sm:$0xff] %vm73_vm1, %v366_v15  ;;  %v436_v17 = vpop.f32.mrb[7].mxu0 }
 0x257   :  { %v371_v18 = vld [vmem:[#allocation2] sm:$0xff] }
 0x258   :  { %372 = vst.msk [vmem:[#allocation6] sm:$0xff] %vm73_vm1, %v371_v18 }
 0x259   :  { %506 = shalt.err (!%p503_p12)
}
 0x25a   :  { %s507_s18 = scalar_lea.hbm %s669_s8, 128 }
 0x25b   :  { %p508_p13 = scmp.ne.s32.totalorder %s669_s8, %s507_s18  ;;  %p511_p0 = scmp.lt.u32.totalorder %s507_s18, %s669_s8 }
 0x25d   :  { %p513_p1 = pnand %p511_p0, %p508_p13 }
 0x25f   :  { %516 = shalt.err (!%p513_p1)
}
 0x260   :  { %382 = dma.vmem_to_hbm [thread:$0]  %s380_s15, 128, %s669_s8, [#allocation5]  }
 0x261   :  { %519 = dma.done.wait [#allocation5], 128  }
 0x262   :  { %520 = vsyncadd [#allocation5], 4294967168 }
 0x263   :  { %386 = vsyncpa [#allocation4], 1 }
 0x264   :  { %387 = vsyncpa [#allocation5], 1 }

</bundles_post_ra>
